<compile_context>
chip_gen: v7x
topology: tpu7x:2x2x1
jax: 0.10.0
libtpu: 0.0.40
codegen_flags: <defaults>
</compile_context>

<pallas_src>
import functools

import jax
import jax.numpy as jnp
from jax.experimental import pallas as pl
from jax.experimental.pallas import tpu as pltpu

DROPOUT_P = 0.5
MSDROPS = 4
NUM_CLASSES = 16  # len(LABELS)


def _round_up(a: int, m: int) -> int:
    return ((a + m - 1) // m) * m


def _padded_shapes(B, K, C, block_b, *, vmem_budget_bytes=24 << 20):
    """Batch tile + lane-dense, (8,128)-aligned padded dims."""
    Kp = _round_up(K, 128)
    Np = _round_up(C, 128)

    # Shrink the batch tile until double-buffered tiles fit a conservative
    # VMEM budget (v7x only has 64 MiB physical / ~32 MiB scoped by default).
    def tile_bytes(t):
        return 2 * (t * Kp * 4 + t * Kp * 4 + t * Np * 4) + Kp * Np * 4 + Np * 4

    tb = max(8, block_b)
    while tb > 8 and tile_bytes(tb) > vmem_budget_bytes:
        tb //= 2

    TB = min(tb, _round_up(B, 8))
    Bp = _round_up(B, TB)
    return TB, Bp, Kp, Np


def _draw_bits(key, Bp, Kp):
    """One uniform u32 per (padded) element; all n dropout decisions are
    derived from disjoint bitfields of this word."""
    return jax.random.bits(key, (Bp, Kp), dtype=jnp.uint32)


def _mcms_kernel(x_ref, bits_ref, w_ref, b_ref, o_ref, *, n, width, thr, scale):
    x = x_ref[...]
    bits = bits_ref[...]                        # int32 view of the u32 draws
    mask = (1 << width) - 1

    # Keep-count: how many of the n dropout samples keep each element.
    count = jnp.zeros(x.shape, jnp.float32)
    for i in range(n):                          # unrolled; n is small (<= 8)
        field = jnp.bitwise_and(jnp.right_shift(bits, width * i), mask)
        count = count + (field < thr).astype(jnp.float32)

    # mean_i drop_i(x) = x * count / (n * keep_prob); scale folds the consts.
    x_eff = x * (count * scale)
    out = jnp.dot(x_eff, w_ref[...], preferred_element_type=jnp.float32)
    o_ref[...] = out + b_ref[...]


def mcms_drop_classifier(x, w, b, key, *, n=MSDROPS, p=DROPOUT_P,
                         training=True, block_b=512):
    """Forward pass of MCMSDropClassifier.

    x: (B, in_dim) f32;  w: (in_dim, C) f32 (transposed vs. nn.Linear weight);
    b: (C,) f32;  key: JAX PRNG key for the dropout masks.
    """
    assert 0.0 <= p < 1.0
    # TODO(synk): n > 8 would need more than one random word per element.
    assert 1 <= n <= 8

    B, K = x.shape
    C = w.shape[1]

    if (not training) or p <= 0.0:
        # Eval mode: dropout is identity, so the mean of n identical heads is
        # just fc(x) -- let XLA fuse this plain affine op.
        return x @ w + b

    keep_prob = 1.0 - p
    width = min(32 // n, 16)                    # random bits per dropout head
    # keep probability quantized to 2^-width (exact for p = 0.5).
    thr = int(round(keep_prob * (1 << width)))
    scale = 1.0 / (n * keep_prob)

    TB, Bp, Kp, Np = _padded_shapes(B, K, C, block_b)

    xp = jnp.zeros((Bp, Kp), jnp.float32).at[:B, :K].set(x.astype(jnp.float32))
    wp = jnp.zeros((Kp, Np), jnp.float32).at[:K, :C].set(w.astype(jnp.float32))
    bp = jnp.zeros((1, Np), jnp.float32).at[0, :C].set(b.astype(jnp.float32))
    bits = jax.lax.bitcast_convert_type(_draw_bits(key, Bp, Kp), jnp.int32)

    kernel = functools.partial(_mcms_kernel, n=n, width=width, thr=thr,
                               scale=scale)

    out = pl.pallas_call(
        kernel,
        grid=(Bp // TB,),
        in_specs=[
            pl.BlockSpec((TB, Kp), lambda i: (i, 0)),   # x tile
            pl.BlockSpec((TB, Kp), lambda i: (i, 0)),   # random-bits tile
            pl.BlockSpec((Kp, Np), lambda i: (0, 0)),   # W (resident)
            pl.BlockSpec((1, Np), lambda i: (0, 0)),    # bias (resident)
        ],
        out_specs=pl.BlockSpec((TB, Np), lambda i: (i, 0)),
        out_shape=jax.ShapeDtypeStruct((Bp, Np), jnp.float32),
        compiler_params=pltpu.CompilerParams(
            dimension_semantics=("parallel",)),
    )(xp, bits, wp, bp)

    return out[:B, :C]


def _reference(x, w, b, key, *, n, p, block_b=512):
    """Pure-JAX reimplementation of the PyTorch forward, reconstructing the
    exact same dropout masks the kernel derives from the shared bit draws."""
    B, K = x.shape
    C = w.shape[1]
    if p <= 0.0:
        return x @ w + b
    keep_prob = 1.0 - p
    width = min(32 // n, 16)
    thr = int(round(keep_prob * (1 << width)))
    _, Bp, Kp, _ = _padded_shapes(B, K, C, block_b)
    bits = _draw_bits(key, Bp, Kp)[:B, :K]      # uint32; logical shifts
    acc = jnp.zeros((B, C), jnp.float32)
    for i in range(n):
        field = (bits >> (width * i)) & ((1 << width) - 1)
        keep = (field < thr).astype(jnp.float32)
        xd = x * keep / keep_prob
        acc = acc + (jnp.dot(xd, w, precision=jax.lax.Precision.HIGHEST) + b)
    return acc / n


if __name__ == "__main__":
    root = jax.random.PRNGKey(0)
    kx, kw, kb, kdrop = jax.random.split(root, 4)

    B, IN_DIM = 8, 32

    x = jax.random.normal(kx, (B, IN_DIM), dtype=jnp.float32)
    # Deterministic nn.Linear-style init: U(-1/sqrt(in_dim), 1/sqrt(in_dim))
    bound = 1.0 / (IN_DIM ** 0.5)
    w = jax.random.uniform(kw, (IN_DIM, NUM_CLASSES), jnp.float32, -bound, bound)
    b = jax.random.uniform(kb, (NUM_CLASSES,), jnp.float32, -bound, bound)

    # Training mode: MC multi-sample dropout averaged inside the kernel.
    out_train = mcms_drop_classifier(x, w, b, kdrop, training=True)
    out_train = jax.block_until_ready(out_train)
    assert out_train.shape == (B, NUM_CLASSES)
    assert bool(jnp.all(jnp.isfinite(out_train)))

    # Must match a pure-JAX forward using the identical dropout masks.
    # (tolerance accommodates MXU multi-pass f32 matmul rounding)
    ref_train = _reference(x, w, b, kdrop, n=MSDROPS, p=DROPOUT_P)
    assert jnp.allclose(out_train, ref_train, atol=1e-2, rtol=1e-2), \
        float(jnp.max(jnp.abs(out_train - ref_train)))

    # Eval mode: dropout is identity -> plain fc(x), kernel bypassed.
    out_eval = mcms_drop_classifier(x, w, b, kdrop, training=False)
    out_eval = jax.block_until_ready(out_eval)
    ref_eval = x @ w + b
    assert jnp.allclose(out_eval, ref_eval, atol=1e-5, rtol=1e-5)

    print("KERNEL_OK")
</pallas_src>

<mosaic_0001>
module attributes {stable_mosaic.version = 11 : i64} {
  func.func @_mcms_kernel(%arg0: i32, %arg1: memref<8x128xf32, #tpu.memory_space<vmem>>, %arg2: memref<8x128xi32, #tpu.memory_space<vmem>>, %arg3: memref<128x128xf32, #tpu.memory_space<vmem>>, %arg4: memref<1x128xf32, #tpu.memory_space<vmem>>, %arg5: memref<8x128xf32, #tpu.memory_space<vmem>>) attributes {dimension_semantics = [#tpu.dimension_semantics<parallel>], iteration_bounds = array<i64: 1>, scalar_prefetch = 0 : i64, scratch_operands = 0 : i64, tpu.core_type = #tpu.core_type<tc>, window_params = [{transform_indices = @transform_0, window_bounds = array<i64: 8, 128>}, {transform_indices = @transform_1, window_bounds = array<i64: 8, 128>}, {pipeline_mode = #tpu.pipeline_mode<synchronous>, transform_indices = @transform_2, window_bounds = array<i64: 128, 128>}, {pipeline_mode = #tpu.pipeline_mode<synchronous>, transform_indices = @transform_3, window_bounds = array<i64: 1, 128>}, {transform_indices = @transform_4, window_bounds = array<i64: 8, 128>}]} {
    %c0 = arith.constant 0 : index
    %c0_0 = arith.constant 0 : index
    %0 = vector.load %arg1[%c0, %c0_0] : memref<8x128xf32, #tpu.memory_space<vmem>>, vector<8x128xf32>
    %c0_1 = arith.constant 0 : index
    %c0_2 = arith.constant 0 : index
    %1 = vector.load %arg2[%c0_1, %c0_2] : memref<8x128xi32, #tpu.memory_space<vmem>>, vector<8x128xi32>
    %cst = arith.constant 0.000000e+00 : f32
    %2 = vector.broadcast %cst : f32 to vector<8x128xf32>
    %c0_i32 = arith.constant 0 : i32
    %3 = vector.broadcast %c0_i32 : i32 to vector<8x128xi32>
    %4 = arith.shrsi %1, %3 : vector<8x128xi32>
    %c255_i32 = arith.constant 255 : i32
    %5 = vector.broadcast %c255_i32 : i32 to vector<8x128xi32>
    %6 = arith.andi %4, %5 : vector<8x128xi32>
    %c128_i32 = arith.constant 128 : i32
    %7 = vector.broadcast %c128_i32 : i32 to vector<8x128xi32>
    %8 = arith.cmpi slt, %6, %7 : vector<8x128xi32>
    %9 = arith.extui %8 : vector<8x128xi1> to vector<8x128xi32>
    %10 = arith.sitofp %9 : vector<8x128xi32> to vector<8x128xf32>
    %11 = arith.addf %2, %10 : vector<8x128xf32>
    %c8_i32 = arith.constant 8 : i32
    %12 = vector.broadcast %c8_i32 : i32 to vector<8x128xi32>
    %13 = arith.shrsi %1, %12 : vector<8x128xi32>
    %c255_i32_3 = arith.constant 255 : i32
    %14 = vector.broadcast %c255_i32_3 : i32 to vector<8x128xi32>
    %15 = arith.andi %13, %14 : vector<8x128xi32>
    %c128_i32_4 = arith.constant 128 : i32
    %16 = vector.broadcast %c128_i32_4 : i32 to vector<8x128xi32>
    %17 = arith.cmpi slt, %15, %16 : vector<8x128xi32>
    %18 = arith.extui %17 : vector<8x128xi1> to vector<8x128xi32>
    %19 = arith.sitofp %18 : vector<8x128xi32> to vector<8x128xf32>
    %20 = arith.addf %11, %19 : vector<8x128xf32>
    %c16_i32 = arith.constant 16 : i32
    %21 = vector.broadcast %c16_i32 : i32 to vector<8x128xi32>
    %22 = arith.shrsi %1, %21 : vector<8x128xi32>
    %c255_i32_5 = arith.constant 255 : i32
    %23 = vector.broadcast %c255_i32_5 : i32 to vector<8x128xi32>
    %24 = arith.andi %22, %23 : vector<8x128xi32>
    %c128_i32_6 = arith.constant 128 : i32
    %25 = vector.broadcast %c128_i32_6 : i32 to vector<8x128xi32>
    %26 = arith.cmpi slt, %24, %25 : vector<8x128xi32>
    %27 = arith.extui %26 : vector<8x128xi1> to vector<8x128xi32>
    %28 = arith.sitofp %27 : vector<8x128xi32> to vector<8x128xf32>
    %29 = arith.addf %20, %28 : vector<8x128xf32>
    %c24_i32 = arith.constant 24 : i32
    %30 = vector.broadcast %c24_i32 : i32 to vector<8x128xi32>
    %31 = arith.shrsi %1, %30 : vector<8x128xi32>
    %c255_i32_7 = arith.constant 255 : i32
    %32 = vector.broadcast %c255_i32_7 : i32 to vector<8x128xi32>
    %33 = arith.andi %31, %32 : vector<8x128xi32>
    %c128_i32_8 = arith.constant 128 : i32
    %34 = vector.broadcast %c128_i32_8 : i32 to vector<8x128xi32>
    %35 = arith.cmpi slt, %33, %34 : vector<8x128xi32>
    %36 = arith.extui %35 : vector<8x128xi1> to vector<8x128xi32>
    %37 = arith.sitofp %36 : vector<8x128xi32> to vector<8x128xf32>
    %38 = arith.addf %29, %37 : vector<8x128xf32>
    %cst_9 = arith.constant 5.000000e-01 : f32
    %39 = vector.broadcast %cst_9 : f32 to vector<8x128xf32>
    %40 = arith.mulf %38, %39 : vector<8x128xf32>
    %41 = arith.mulf %0, %40 : vector<8x128xf32>
    %c0_10 = arith.constant 0 : index
    %c0_11 = arith.constant 0 : index
    %42 = vector.load %arg3[%c0_10, %c0_11] : memref<128x128xf32, #tpu.memory_space<vmem>>, vector<128x128xf32>
    %cst_12 = arith.constant dense<0.000000e+00> : vector<8x128xf32>
    %43 = tpu.matmul %41, %42, %cst_12 {dimension_numbers = #tpu.dot_dimension_numbers<[1], [0], [0], [1], [0, 0, 1, 1], [], []>} : vector<8x128xf32>, vector<128x128xf32>, vector<8x128xf32> -> vector<8x128xf32>
    %c0_13 = arith.constant 0 : index
    %c0_14 = arith.constant 0 : index
    %44 = vector.load %arg4[%c0_13, %c0_14] : memref<1x128xf32, #tpu.memory_space<vmem>>, vector<1x128xf32>
    %45 = vector.broadcast %44 : vector<1x128xf32> to vector<8x128xf32>
    %46 = arith.addf %43, %45 : vector<8x128xf32>
    %c0_15 = arith.constant 0 : index
    %c0_16 = arith.constant 0 : index
    %47 = vector.load %arg5[%c0_15, %c0_16] : memref<8x128xf32, #tpu.memory_space<vmem>>, vector<8x128xf32>
    tpu.vector_store %arg5[%c0_15, %c0_16], %46 {strides = array<i32>} : memref<8x128xf32, #tpu.memory_space<vmem>>, vector<8x128xf32>,
    return
  }
  func.func @transform_0(%arg0: i32) -> (i32, i32) {
    %c0_i32 = arith.constant 0 : i32
    %c0_i32_0 = arith.constant 0 : i32
    return %arg0, %c0_i32 : i32, i32
  }
  func.func @transform_1(%arg0: i32) -> (i32, i32) {
    %c0_i32 = arith.constant 0 : i32
    %c0_i32_0 = arith.constant 0 : i32
    return %arg0, %c0_i32 : i32, i32
  }
  func.func @transform_2(%arg0: i32) -> (i32, i32) {
    %c0_i32 = arith.constant 0 : i32
    %c0_i32_0 = arith.constant 0 : i32
    %c0_i32_1 = arith.constant 0 : i32
    return %c0_i32, %c0_i32_0 : i32, i32
  }
  func.func @transform_3(%arg0: i32) -> (i32, i32) {
    %c0_i32 = arith.constant 0 : i32
    %c0_i32_0 = arith.constant 0 : i32
    %c0_i32_1 = arith.constant 0 : i32
    return %c0_i32, %c0_i32_0 : i32, i32
  }
  func.func @transform_4(%arg0: i32) -> (i32, i32) {
    %c0_i32 = arith.constant 0 : i32
    %c0_i32_0 = arith.constant 0 : i32
    return %arg0, %c0_i32 : i32, i32
  }
}

</mosaic_0001>

<bundles_post_ra>
// kernel: tpu_custom_call.1
= control target key start
LH: loop header
LB: loop body
LE: loop exit
PB: predicated region body
PF: predicated region fallthrough
CT: control target
= control target key end

     0   :  { %9 = vsyncpa [#allocation3], 0  ;;  %s462_s0 = inlined_call_operand.hbm [shape: f32[8,128], index: 0, kind: input, shape index: {}]   ;;  %s463_s1 = inlined_call_operand.hbm [shape: s32[8,128], index: 1, kind: input, shape index: {}]   ;;  %s464_s2 = inlined_call_operand.hbm [shape: f32[128,128], index: 2, kind: input, shape index: {}]   ;;  %s465_s3 = inlined_call_operand.vmem [shape: f32[1,128], index: 3, kind: input, shape index: {}]   ;;  %s466_s4 = inlined_call_operand.hbm [shape: f32[8,128], index: 4, kind: output, shape index: {}]  }
   0x1   :  { %10 = vsyncpa [#allocation6], 0 }
   0x2   :  { %11 = vsyncpa [#allocation4], 0  ;;  %s377_s15 = smov [#allocation5]   ;;  %s378_s17 = smov [#allocation2]  }
   0x3   :  { %s28_s16 = sshll.u32 %s377_s15, 4  ;;  %s18_s18 = sshll.u32 %s378_s17, 4  ;;  %s29_s16 = int_to_ptr.vmem [resolvable:$true] %s28_s16  ;;  %s19_s18 = int_to_ptr.vmem [resolvable:$true] %s18_s18 }
   0x4   :  { %s283_s21 = scalar_lea.hbm %s463_s1, 128 }
   0x5   :  { %p284_p0 = scmp.ne.s32.totalorder %s463_s1, %s283_s21  ;;  %p287_p1 = scmp.lt.u32.totalorder %s283_s21, %s463_s1 }
   0x7   :  { %p289_p2 = pnand %p287_p1, %p284_p0 }
   0x9   :  { %292 = shalt.err (!%p289_p2)
}
   0xa   :  { %s293_s26 = scalar_lea.vmem %s29_s16, 128  ;;  %p298_p4 = scmp.lt.s32.totalorder %s29_s16, %s29_s16 }
   0xb   :  { %p294_p3 = scmp.ne.s32.totalorder %s29_s16, %s293_s26  ;;  %p299_p5 = scmp.lt.s32.totalorder %s293_s26, %s293_s26 }
   0xd   :  { %p300_p6 = por %p299_p5, %p298_p4 }
   0xf   :  { %p301_p7 = pnand %p300_p6, %p294_p3 }
  0x11   :  { %304 = shalt.err (!%p301_p7)
}
  0x12   :  { %31 = dma.hbm_to_vmem [thread:$0]  %s463_s1, 128, %s29_s16, [#allocation6]  }
  0x13   :  { %s305_s5 = scalar_lea.hbm %s462_s0, 128 }
  0x14   :  { %p306_p8 = scmp.ne.s32.totalorder %s462_s0, %s305_s5  ;;  %p309_p9 = scmp.lt.u32.totalorder %s305_s5, %s462_s0 }
  0x16   :  { %p311_p10 = pnand %p309_p9, %p306_p8 }
  0x18   :  { %314 = shalt.err (!%p311_p10)
}
  0x19   :  { %s315_s10 = scalar_lea.vmem %s19_s18, 128  ;;  %p320_p12 = scmp.lt.s32.totalorder %s19_s18, %s19_s18 }
  0x1a   :  { %p316_p11 = scmp.ne.s32.totalorder %s19_s18, %s315_s10  ;;  %p321_p13 = scmp.lt.s32.totalorder %s315_s10, %s315_s10 }
  0x1c   :  { %p322_p0 = por %p321_p13, %p320_p12 }
  0x1e   :  { %p323_p1 = pnand %p322_p0, %p316_p11 }
  0x20   :  { %326 = shalt.err (!%p323_p1)
}
  0x21   :  { %21 = dma.hbm_to_vmem [thread:$0]  %s462_s0, 128, %s19_s18, [#allocation3]  }
  0x22   :  { %s379_s12 = smov [#allocation7]   ;;  %s327_s16 = scalar_lea.hbm %s464_s2, 2048 }
  0x23   :  { %s37_s13 = sshll.u32 %s379_s12, 4  ;;  %p328_p2 = scmp.ne.s32.totalorder %s464_s2, %s327_s16  ;;  %s38_s13 = int_to_ptr.vmem [resolvable:$true] %s37_s13 }
  0x24   :  { %p331_p3 = scmp.lt.u32.totalorder %s327_s16, %s464_s2 }
  0x26   :  { %p333_p4 = pnand %p331_p3, %p328_p2 }
  0x28   :  { %336 = shalt.err (!%p333_p4)
}
  0x29   :  { %s337_s22 = scalar_lea.vmem %s38_s13, 2048  ;;  %p342_p6 = scmp.lt.s32.totalorder %s38_s13, %s38_s13 }
  0x2a   :  { %p338_p5 = scmp.ne.s32.totalorder %s38_s13, %s337_s22  ;;  %p343_p7 = scmp.lt.s32.totalorder %s337_s22, %s337_s22 }
  0x2c   :  { %p344_p8 = por %p343_p7, %p342_p6 }
  0x2e   :  { %p345_p9 = pnand %p344_p8, %p338_p5 }
  0x30   :  { %348 = shalt.err (!%p345_p9)
}
  0x31   :  { %s380_s0 = smov 128   ;;  %s381_s18 = smov 8  }
  0x32   :  { %43 = dma.hbm_to_vmem [thread:$0]  %s464_s2, 2048, %s38_s13, [#allocation6], %s380_s0, %s380_s0, %s381_s18  }
  0x33   :  { %371 = dma.done.wait [#allocation3], 128  }
  0x34   :  { %372 = vsyncadd [#allocation3], 4294967168 }
  0x35   :  { %373 = dma.done.wait [#allocation6], 2176  }
  0x36   :  { %374 = vsyncadd [#allocation6], 4294965120  ;;  %v382_v0 = vmov 0.0|0.0   ;;  %vm383_vm0 = vmmov 0   ;;  %v384_v1 = vmov 0.0   ;;  %v82_v2 = vld [vmem:[#allocation7] sm:$0xff] }
  0x37   :  { %250 = vmatprep.subr.bf16.mxu0 %v382_v0  ;;  %247 = vmatprep.mubr.msk.f32.mxu0 %vm383_vm0, %v384_v1  ;;  %v83_v3 = vld [vmem:[#allocation7 + $0x8] sm:$0xff]  ;;  %v84_v4 = vld [vmem:[#allocation7 + $0x10] sm:$0xff]  ;;  %v85_v6 = vld [vmem:[#allocation7 + $0x18] sm:$0xff]  ;;  %s385_s26 = smov [#allocation8]  }
  0x38   :  { %v251_v5 = vpack.c.bf16 %v83_v3, %v82_v2  ;;  %v254_v7 = vpack.c.bf16 %v85_v6, %v84_v4  ;;  %v86_v8 = vld [vmem:[#allocation7 + $0x20] sm:$0xff]  ;;  %v87_v9 = vld [vmem:[#allocation7 + $0x28] sm:$0xff]  ;;  %v56_v10 = vld [vmem:[#allocation5] sm:$0xff]  ;;  %s182_s27 = sshll.u32 %s385_s26, 4  ;;  %s183_s27 = int_to_ptr.vmem [resolvable:$true] %s182_s27 }
  0x39   :  { %v57_v11 = vand.u32 255, %v56_v10  ;;  %v62_v12 = vshra.s32 %v56_v10, 8  ;;  %v68_v13 = vshra.s32 %v56_v10, 16  ;;  %v257_v14 = vpack.c.bf16 %v87_v9, %v86_v8  ;;  %v88_v15 = vld [vmem:[#allocation7 + $0x30] sm:$0xff]  ;;  %v89_v16 = vld [vmem:[#allocation7 + $0x38] sm:$0xff]  ;;  %v90_v22 = vld [vmem:[#allocation7 + $0x40] sm:$0xff]  ;;  %p354_p11 = scmp.lt.s32.totalorder %s183_s27, %s183_s27 }
  0x3a   :  { %252 = vmatpush3.bf16.msra.mxu0 %v251_v5  ;;  %v260_v19 = vpack.c.bf16 %v89_v16, %v88_v15  ;;  %v91_v23 = vld [vmem:[#allocation7 + $0x48] sm:$0xff]  ;;  %v195_v24 = vshrl.u32 %v56_v10, 24  ;;  %v92_v28 = vld [vmem:[#allocation7 + $0x50] sm:$0xff]  ;;  %v93_v29 = vld [vmem:[#allocation7 + $0x58] sm:$0xff]  ;;  %s349_s28 = scalar_lea.vmem %s183_s27, 128 }
  0x3b   :  { %253 = vmatprep.subr.bf16.mxu0 %v382_v0  ;;  %vm58_vm1 = vcmp.lt.s32.totalorder %v57_v11, 128  ;;  %v63_v17 = vand.u32 255, %v62_v12  ;;  %v69_v18 = vand.u32 255, %v68_v13  ;;  %v263_v26 = vpack.c.bf16 %v91_v23, %v90_v22  ;;  %v94_v33 = vld [vmem:[#allocation7 + $0x60] sm:$0xff]  ;;  %v95_v34 = vld [vmem:[#allocation7 + $0x68] sm:$0xff]  ;;  %v96_v37 = vld [vmem:[#allocation7 + $0x70] sm:$0xff]  ;;  %p350_p10 = scmp.ne.s32.totalorder %s183_s27, %s349_s28  ;;  %p355_p12 = scmp.lt.s32.totalorder %s349_s28, %s349_s28 }
  0x3c   :  { %v192_v20 = vsel %vm58_vm1, 1.0, %v384_v1  ;;  %vm76_vm4 = vcmp.lt.s32.totalorder %v195_v24, 128  ;;  %v266_v31 = vpack.c.bf16 %v93_v29, %v92_v28  ;;  %v269_v36 = vpack.c.bf16 %v95_v34, %v94_v33  ;;  %v97_v38 = vld [vmem:[#allocation7 + $0x78] sm:$0xff]  ;;  %v55_v41 = vld [vmem:[#allocation2] sm:$0xff] }
  0x3d   :  { %vm64_vm2 = vcmp.lt.s32.totalorder %v63_v17, 128  ;;  %vm70_vm3 = vcmp.lt.s32.totalorder %v69_v18, 128  ;;  %v196_v32 = vsel %vm76_vm4, 1.0, %v384_v1  ;;  %v272_v40 = vpack.c.bf16 %v97_v38, %v96_v37  ;;  %v197_v43 = vld [vmem:[%s465_s3] ss:$0 sm:$0xff]  ;;  %p356_p13 = por %p355_p12, %p354_p11 }
  0x3e   :  { %255 = vmatpush3.bf16.msra.mxu0 %v254_v7  ;;  %v193_v21 = vsel %vm64_vm2, 1.0, %v384_v1  ;;  %v194_v27 = vsel %vm70_vm3, 1.0, %v384_v1 }
  0x3f   :  { %256 = vmatprep.subr.bf16.mxu0 %v382_v0  ;;  %v67_v25 = vadd.f32 %v193_v21, %v192_v20  ;;  %p357_p0 = pnand %p356_p13, %p350_p10 }
  0x41   :  { %v73_v30 = vadd.f32 %v194_v27, %v67_v25 }
  0x42   :  { %258 = vmatpush3.bf16.msra.mxu0 %v257_v14 }
  0x43   :  { %259 = vmatprep.subr.bf16.mxu0 %v382_v0  ;;  %v79_v35 = vadd.f32 %v196_v32, %v73_v30 }
  0x45   :  { %v80_v39 = vmul.f32 0.5, %v79_v35 }
  0x46   :  { %261 = vmatpush3.bf16.msra.mxu0 %v260_v19 }
  0x47   :  { %262 = vmatprep.subr.bf16.mxu0 %v382_v0  ;;  %v81_v42 = vmul.f32 %v80_v39, %v55_v41 }
  0x4a   :  { %264 = vmatpush3.bf16.msra.mxu0 %v263_v26 }
  0x4b   :  { %265 = vmatprep.subr.bf16.mxu0 %v382_v0 }
  0x4e   :  { %267 = vmatpush3.bf16.msra.mxu0 %v266_v31 }
  0x4f   :  { %268 = vmatprep.subr.bf16.mxu0 %v382_v0 }
  0x52   :  { %270 = vmatpush3.bf16.msra.mxu0 %v269_v36 }
  0x53   :  { %271 = vmatprep.subr.bf16.mxu0 %v382_v0 }
  0x56   :  { %273 = vmatpush3.bf16.msra.mxu0 %v272_v40 }
  0x59   :  { %248 = vmatmul.mubr.f32.vlgmr.msra.gmra.mrb[0].mxu0 %v81_v42 }
 0x12c   :  { %v171_v44 = vpop.f32.mrb[0].mxu0 }
 0x12d   :  { %v172_v45 = vadd.f32 %v197_v43, %v171_v44  ;;  %v249_v46 = vpop.f32.mrb[1].mxu0 }
 0x12f   :  { %175 = vst [vmem:[#allocation8] sm:$0xff] %v172_v45 }
 0x130   :  { %360 = shalt.err (!%p357_p0)
}
 0x131   :  { %s361_s5 = scalar_lea.hbm %s466_s4, 128 }
 0x132   :  { %p362_p1 = scmp.ne.s32.totalorder %s466_s4, %s361_s5  ;;  %p365_p2 = scmp.lt.u32.totalorder %s361_s5, %s466_s4 }
 0x134   :  { %p367_p3 = pnand %p365_p2, %p362_p1 }
 0x136   :  { %370 = shalt.err (!%p367_p3)
}
 0x137   :  { %185 = dma.vmem_to_hbm [thread:$0]  %s183_s27, 128, %s466_s4, [#allocation4]  }
 0x138   :  { %375 = dma.done.wait [#allocation4], 128  }
 0x139   :  { %376 = vsyncadd [#allocation4], 4294967168 }
 0x13a   :  { %189 = vsyncpa [#allocation3], 1 }
 0x13b   :  { %190 = vsyncpa [#allocation6], 1 }
 0x13c   :  { %191 = vsyncpa [#allocation4], 1 }

</bundles_post_ra>
